<compile_context>
chip_gen: v7x
topology: tpu7x:2x2x1
jax: 0.10.0
libtpu: 0.0.40
codegen_flags: <defaults>
</compile_context>

<pallas_src>
import math

import jax
import jax.numpy as jnp
from jax.experimental import pallas as pl
from jax.experimental.pallas import tpu as pltpu


def _round_up(x, mult):
    return ((x + mult - 1) // mult) * mult


def _pick_tn(C, tn_req):
    """Largest tile <= tn_req (multiple of 128) that divides C."""
    tn = min(_round_up(tn_req, 128), C)
    while C % tn != 0:
        tn -= 128
    return max(tn, 128)


def _make_margin_kernel(*, s, cos_m, sin_m, mm, threshold, tn, tb, eps,
                        is_infer):
    def _normalize_slab(w_ref, wnorm_ref, b):
        # Normalize once per class slab (b == 0) and cache in VMEM scratch.
        @pl.when(b == 0)
        def _():
            w = w_ref[...].astype(jnp.float32)                  # (E, TN)
            inv = jax.lax.rsqrt(jnp.sum(w * w, axis=0, keepdims=True) + eps)
            wnorm_ref[...] = w * inv

    if is_infer:
        def kernel(emb_ref, w_ref, out_ref, wnorm_ref):
            b = pl.program_id(1)
            _normalize_slab(w_ref, wnorm_ref, b)
            emb = emb_ref[...].astype(jnp.float32)              # (tb, E)
            cos_theta = jnp.dot(emb, wnorm_ref[...],
                                preferred_element_type=jnp.float32)
            cos_theta = jnp.clip(cos_theta, -1.0, 1.0)
            out_ref[...] = (cos_theta * s).astype(out_ref.dtype)
        return kernel

    def kernel(label_ref, emb_ref, w_ref, out_ref, wnorm_ref):
        j = pl.program_id(0)
        b = pl.program_id(1)
        _normalize_slab(w_ref, wnorm_ref, b)

        # --- cos(theta) = embeddings @ kernel_norm, clamped to [-1, 1] ---
        emb = emb_ref[...].astype(jnp.float32)                  # (tb, E)
        cos_theta = jnp.dot(emb, wnorm_ref[...],
                            preferred_element_type=jnp.float32)
        cos_theta = jnp.clip(cos_theta, -1.0, 1.0)              # (tb, TN)

        # --- margin: cos(theta + m) with the "easy margin" fallback ---
        sin_theta = jnp.sqrt(1.0 - cos_theta * cos_theta)
        cos_theta_m = cos_theta * cos_m - sin_theta * sin_m
        keep_val = cos_theta - mm
        cos_theta_m = jnp.where((cos_theta - threshold) <= 0.0,
                                keep_val, cos_theta_m)

        # --- output[i, label[i]] = cos_theta_m[i, label[i]] ---
        # Fixed 0..TN-1 lane iota compared against (label - j*TN): the tile
        # offset is folded into the (tb,1) label vector, not the (tb,TN) iota.
        lbl_local = label_ref[...] - j * tn                     # (tb, 1)
        col_ids = jax.lax.broadcasted_iota(jnp.int32, (tb, tn), 1)
        out = jnp.where(col_ids == lbl_local, cos_theta_m, cos_theta)

        out_ref[...] = (out * s).astype(out_ref.dtype)

    return kernel


def margin_linear(embeddings, weight, label=None, *, s=64.0, m=0.5,
                  is_infer=False, tn=512, max_batch_tile=256, eps=0.0):
    """Pallas implementation of MagrginLinear.forward.

    embeddings: (nB, E) float32
    weight:     (E, C) float32 or bfloat16 (normalized per-column inside)
    label:      (nB,)  int32   (ignored / may be None when is_infer=True)
    returns:    (nB, C) float32
    """
    nB, E = embeddings.shape
    E2, C = weight.shape
    assert E == E2
    assert C % 128 == 0, "classnum must be a multiple of 128"

    tn = _pick_tn(C, tn)

    # --- batch tiling (sublane-aligned); pad batch if needed ---------------
    nB_pad = _round_up(nB, 8)
    if nB_pad <= max_batch_tile:
        tb = nB_pad
    else:
        tb = _round_up(max_batch_tile, 8)
        nB_pad = _round_up(nB, tb)
    bt = nB_pad // tb

    if nB_pad != nB:
        embeddings = jnp.pad(embeddings, ((0, nB_pad - nB), (0, 0)))
        if not is_infer:
            label = jnp.pad(label, (0, nB_pad - nB))

    cos_m = math.cos(m)
    sin_m = math.sin(m)
    mm = sin_m * m
    threshold = math.cos(math.pi - m)

    kern = _make_margin_kernel(s=s, cos_m=cos_m, sin_m=sin_m, mm=mm,
                               threshold=threshold, tn=tn, tb=tb, eps=eps,
                               is_infer=is_infer)

    # --- specs: drop the label operand entirely in inference mode ----------
    in_specs = []
    args = []
    if not is_infer:
        label2d = label.astype(jnp.int32).reshape(nB_pad, 1)
        in_specs.append(pl.BlockSpec((tb, 1), lambda j, b: (b, 0)))
        args.append(label2d)
    in_specs += [
        pl.BlockSpec((tb, E), lambda j, b: (b, 0)),   # embeddings batch tile
        pl.BlockSpec((E, tn), lambda j, b: (0, j)),   # weight column slab
    ]
    args += [embeddings, weight]

    # --- explicit VMEM budget (double-buffered inputs/outputs + scratch) ---
    w_item = jnp.dtype(weight.dtype).itemsize
    vmem_need = (2 * E * tn * w_item        # weight double buffer
                 + E * tn * 4               # normalized-weight scratch
                 + 2 * tb * E * 4           # embeddings double buffer
                 + 2 * tb * tn * 4          # output double buffer
                 + 2 * tb * 128 * 4)        # labels (lane-padded)
    vmem_limit = int(min(max(2 * vmem_need, 32 << 20), 64 << 20))

    cost = pl.CostEstimate(
        flops=2 * nB_pad * E * C + 3 * E * C + 8 * nB_pad * C,
        transcendentals=nB_pad * C + C,
        bytes_accessed=E * C * w_item + nB_pad * E * 4 + nB_pad * C * 4
                       + nB_pad * 4,
    )

    out = pl.pallas_call(
        kern,
        out_shape=jax.ShapeDtypeStruct((nB_pad, C), jnp.float32),
        grid_spec=pltpu.PrefetchScalarGridSpec(
            num_scalar_prefetch=0,
            grid=(C // tn, bt),                        # class outer, batch inner
            in_specs=in_specs,
            out_specs=pl.BlockSpec((tb, tn), lambda j, b: (b, j)),
            scratch_shapes=[pltpu.VMEM((E, tn), jnp.float32)],
        ),
        compiler_params=pltpu.CompilerParams(
            dimension_semantics=("parallel", "arbitrary"),
            vmem_limit_bytes=vmem_limit,
        ),
        cost_estimate=cost,
    )(*args)

    return out[:nB] if nB_pad != nB else out


def _reference(embeddings, weight, label, *, s=64.0, m=0.5, is_infer=False):
    """Pure-JAX reference mirroring the PyTorch module."""
    cos_m = math.cos(m)
    sin_m = math.sin(m)
    mm = sin_m * m
    threshold = math.cos(math.pi - m)

    kernel_norm = weight / jnp.linalg.norm(weight, axis=0, keepdims=True)
    cos_theta = jnp.clip(embeddings @ kernel_norm, -1.0, 1.0)
    sin_theta = jnp.sqrt(1.0 - cos_theta ** 2)
    cos_theta_m = cos_theta * cos_m - sin_theta * sin_m
    keep_val = cos_theta - mm
    cos_theta_m = jnp.where(cos_theta - threshold <= 0, keep_val, cos_theta_m)
    output = cos_theta
    if not is_infer:
        one_hot = jax.nn.one_hot(label, cos_theta.shape[1], dtype=bool)
        output = jnp.where(one_hot, cos_theta_m, cos_theta)
    return output * s


if __name__ == "__main__":
    # Small, TPU-friendly shapes consistent with the module's forward:
    # batch=8, embedding_size=32, classnum=256.
    nB, E, C = 8, 32, 256

    key = jax.random.PRNGKey(0)
    k_emb, k_w, k_lbl = jax.random.split(key, 3)

    embeddings = jax.random.normal(k_emb, (nB, E), dtype=jnp.float32)
    # Deterministic stand-in for torch's uniform_(-1,1).renorm_().mul_() init;
    # the forward normalizes the kernel columns anyway.
    weight = jax.random.uniform(k_w, (E, C), dtype=jnp.float32,
                                minval=-1.0, maxval=1.0)
    label = jax.random.randint(k_lbl, (nB,), 0, C, dtype=jnp.int32)

    # Training path (f32 weights).
    out = margin_linear(embeddings, weight, label, s=64.0, m=0.5)
    out = jax.block_until_ready(out)
    ref = _reference(embeddings, weight, label, s=64.0, m=0.5)
    assert out.shape == (nB, C)
    assert jnp.allclose(out, ref, atol=1e-3, rtol=1e-3), "train path mismatch"

    # Inference path (no label operand, margin math skipped).
    out_inf = jax.block_until_ready(
        margin_linear(embeddings, weight, None, s=64.0, m=0.5, is_infer=True))
    ref_inf = _reference(embeddings, weight, label, s=64.0, m=0.5,
                         is_infer=True)
    assert jnp.allclose(out_inf, ref_inf, atol=1e-3, rtol=1e-3), \
        "infer path mismatch"

    # bf16 weight storage (halves the dominant HBM stream); compare against a
    # reference built from the same bf16-rounded weights.
    w_bf16 = weight.astype(jnp.bfloat16)
    out_bf = jax.block_until_ready(
        margin_linear(embeddings, w_bf16, label, s=64.0, m=0.5))
    ref_bf = _reference(embeddings, w_bf16.astype(jnp.float32), label,
                        s=64.0, m=0.5)
    assert jnp.allclose(out_bf, ref_bf, atol=1e-2, rtol=1e-2), \
        "bf16-weight path mismatch"

    print("KERNEL_OK")
</pallas_src>

<mosaic_0001>
module attributes {stable_mosaic.version = 11 : i64} {
  func.func @kernel(%arg0: i32, %arg1: i32, %arg2: memref<8x1xi32, #tpu.memory_space<vmem>>, %arg3: memref<8x32xf32, #tpu.memory_space<vmem>>, %arg4: memref<32x256xf32, #tpu.memory_space<vmem>>, %arg5: memref<8x256xf32, #tpu.memory_space<vmem>>, %arg6: memref<32x256xf32, #tpu.memory_space<vmem>>) attributes {dimension_semantics = [#tpu.dimension_semantics<parallel>, #tpu.dimension_semantics<arbitrary>], iteration_bounds = array<i64: 1, 1>, scalar_prefetch = 0 : i64, scratch_operands = 1 : i64, tpu.core_type = #tpu.core_type<tc>, window_params = [{transform_indices = @transform_0, window_bounds = array<i64: 8, 1>}, {transform_indices = @transform_1, window_bounds = array<i64: 8, 32>}, {transform_indices = @transform_2, window_bounds = array<i64: 32, 256>}, {transform_indices = @transform_3, window_bounds = array<i64: 8, 256>}]} {
    %c0_i32 = arith.constant 0 : i32
    %0 = arith.cmpi eq, %arg1, %c0_i32 : i32
    %1 = arith.extui %0 : i1 to i32
    %c0_i32_0 = arith.constant 0 : i32
    %2 = arith.cmpi ne, %1, %c0_i32_0 : i32
    scf.if %2 {
      %c0_17 = arith.constant 0 : index
      %c0_18 = arith.constant 0 : index
      %37 = vector.load %arg4[%c0_17, %c0_18] : memref<32x256xf32, #tpu.memory_space<vmem>>, vector<32x256xf32>
      %38 = arith.mulf %37, %37 : vector<32x256xf32>
      %cst_19 = arith.constant dense<0.000000e+00> : vector<256xf32>
      %39 = vector.multi_reduction <add>, %38, %cst_19 [0] : vector<32x256xf32> to vector<256xf32>
      %40 = vector.shape_cast %39 : vector<256xf32> to vector<1x256xf32>
      %cst_20 = arith.constant 0.000000e+00 : f32
      %41 = vector.broadcast %cst_20 : f32 to vector<1x256xf32>
      %42 = arith.addf %40, %41 : vector<1x256xf32>
      %43 = math.rsqrt %42 : vector<1x256xf32>
      %44 = vector.broadcast %43 : vector<1x256xf32> to vector<32x256xf32>
      %45 = arith.mulf %37, %44 : vector<32x256xf32>
      %c0_21 = arith.constant 0 : index
      %c0_22 = arith.constant 0 : index
      %46 = vector.load %arg6[%c0_21, %c0_22] : memref<32x256xf32, #tpu.memory_space<vmem>>, vector<32x256xf32>
      tpu.vector_store %arg6[%c0_21, %c0_22], %45 {strides = array<i32>} : memref<32x256xf32, #tpu.memory_space<vmem>>, vector<32x256xf32>,
    } else {
    }
    %c0 = arith.constant 0 : index
    %c0_1 = arith.constant 0 : index
    %3 = vector.load %arg3[%c0, %c0_1] : memref<8x32xf32, #tpu.memory_space<vmem>>, vector<8x32xf32>
    %c0_2 = arith.constant 0 : index
    %c0_3 = arith.constant 0 : index
    %4 = vector.load %arg6[%c0_2, %c0_3] : memref<32x256xf32, #tpu.memory_space<vmem>>, vector<32x256xf32>
    %cst = arith.constant dense<0.000000e+00> : vector<8x256xf32>
    %5 = tpu.matmul %3, %4, %cst {dimension_numbers = #tpu.dot_dimension_numbers<[1], [0], [0], [1], [0, 0, 1, 1], [], []>} : vector<8x32xf32>, vector<32x256xf32>, vector<8x256xf32> -> vector<8x256xf32>
    %cst_4 = arith.constant -1.000000e+00 : f32
    %cst_5 = arith.constant 1.000000e+00 : f32
    %6 = vector.broadcast %cst_4 : f32 to vector<8x256xf32>
    %7 = arith.maximumf %6, %5 : vector<8x256xf32>
    %8 = vector.broadcast %cst_5 : f32 to vector<8x256xf32>
    %9 = arith.minimumf %8, %7 : vector<8x256xf32>
    %10 = arith.mulf %9, %9 : vector<8x256xf32>
    %cst_6 = arith.constant 1.000000e+00 : f32
    %11 = vector.broadcast %cst_6 : f32 to vector<8x256xf32>
    %12 = arith.subf %11, %10 : vector<8x256xf32>
    %13 = math.sqrt %12 : vector<8x256xf32>
    %cst_7 = arith.constant 0.87758255 : f32
    %14 = vector.broadcast %cst_7 : f32 to vector<8x256xf32>
    %15 = arith.mulf %9, %14 : vector<8x256xf32>
    %cst_8 = arith.constant 0.47942555 : f32
    %16 = vector.broadcast %cst_8 : f32 to vector<8x256xf32>
    %17 = arith.mulf %13, %16 : vector<8x256xf32>
    %18 = arith.subf %15, %17 : vector<8x256xf32>
    %cst_9 = arith.constant 0.239712775 : f32
    %19 = vector.broadcast %cst_9 : f32 to vector<8x256xf32>
    %20 = arith.subf %9, %19 : vector<8x256xf32>
    %cst_10 = arith.constant -0.87758255 : f32
    %21 = vector.broadcast %cst_10 : f32 to vector<8x256xf32>
    %22 = arith.subf %9, %21 : vector<8x256xf32>
    %cst_11 = arith.constant 0.000000e+00 : f32
    %23 = vector.broadcast %cst_11 : f32 to vector<8x256xf32>
    %24 = arith.cmpf ole, %22, %23 : vector<8x256xf32>
    %25 = arith.select %24, %20, %18 : vector<8x256xi1>, vector<8x256xf32>
    %c0_12 = arith.constant 0 : index
    %c0_13 = arith.constant 0 : index
    %26 = vector.load %arg2[%c0_12, %c0_13] : memref<8x1xi32, #tpu.memory_space<vmem>>, vector<8x1xi32>
    %c256_i32 = arith.constant 256 : i32
    %27 = arith.muli %arg0, %c256_i32 : i32
    %28 = vector.broadcast %27 : i32 to vector<8x1xi32>
    %29 = arith.subi %26, %28 : vector<8x1xi32>
    %30 = tpu.iota {dimensions = array<i32: 1>} : vector<8x256xi32>
    %31 = vector.broadcast %29 : vector<8x1xi32> to vector<8x256xi32>
    %32 = arith.cmpi eq, %30, %31 : vector<8x256xi32>
    %33 = arith.select %32, %25, %9 : vector<8x256xi1>, vector<8x256xf32>
    %cst_14 = arith.constant 6.400000e+01 : f32
    %34 = vector.broadcast %cst_14 : f32 to vector<8x256xf32>
    %35 = arith.mulf %33, %34 : vector<8x256xf32>
    %c0_15 = arith.constant 0 : index
    %c0_16 = arith.constant 0 : index
    %36 = vector.load %arg5[%c0_15, %c0_16] : memref<8x256xf32, #tpu.memory_space<vmem>>, vector<8x256xf32>
    tpu.vector_store %arg5[%c0_15, %c0_16], %35 {strides = array<i32>} : memref<8x256xf32, #tpu.memory_space<vmem>>, vector<8x256xf32>,
    return
  }
  func.func @transform_0(%arg0: i32, %arg1: i32) -> (i32, i32) {
    %c0_i32 = arith.constant 0 : i32
    %c0_i32_0 = arith.constant 0 : i32
    return %arg1, %c0_i32 : i32, i32
  }
  func.func @transform_1(%arg0: i32, %arg1: i32) -> (i32, i32) {
    %c0_i32 = arith.constant 0 : i32
    %c0_i32_0 = arith.constant 0 : i32
    return %arg1, %c0_i32 : i32, i32
  }
  func.func @transform_2(%arg0: i32, %arg1: i32) -> (i32, i32) {
    %c0_i32 = arith.constant 0 : i32
    %c0_i32_0 = arith.constant 0 : i32
    return %c0_i32, %arg0 : i32, i32
  }
  func.func @transform_3(%arg0: i32, %arg1: i32) -> (i32, i32) {
    %c0_i32 = arith.constant 0 : i32
    return %arg1, %arg0 : i32, i32
  }
}

</mosaic_0001>

<bundles_post_ra>
// kernel: tpu_custom_call.1
= control target key start
LH: loop header
LB: loop body
LE: loop exit
PB: predicated region body
PF: predicated region fallthrough
CT: control target
= control target key end

     0   :  { %8 = vsyncpa [#allocation4], 0  ;;  %s374_s0 = inlined_call_operand.vmem [shape: s32[8,1], index: 0, kind: input, shape index: {}]   ;;  %s375_s1 = inlined_call_operand.vmem [shape: f32[8,32], index: 1, kind: input, shape index: {}]   ;;  %s376_s2 = inlined_call_operand.hbm [shape: f32[32,256], index: 2, kind: input, shape index: {}]   ;;  %s377_s3 = inlined_call_operand.hbm [shape: f32[8,256], index: 3, kind: output, shape index: {}]  }
   0x1   :  { %9 = vsyncpa [#allocation5], 0  ;;  %s318_s12 = smov [#allocation3]   ;;  %s270_s16 = scalar_lea.hbm %s376_s2, 1024 }
   0x2   :  { %s19_s13 = sshll.u32 %s318_s12, 4  ;;  %p271_p0 = scmp.ne.s32.totalorder %s376_s2, %s270_s16  ;;  %s20_s13 = int_to_ptr.vmem [resolvable:$true] %s19_s13 }
   0x3   :  { %p274_p1 = scmp.lt.u32.totalorder %s270_s16, %s376_s2 }
   0x5   :  { %p276_p2 = pnand %p274_p1, %p271_p0 }
   0x7   :  { %279 = shalt.err (!%p276_p2)
}
   0x8   :  { %s280_s21 = scalar_lea.vmem %s20_s13, 1024  ;;  %p285_p4 = scmp.lt.s32.totalorder %s20_s13, %s20_s13 }
   0x9   :  { %p281_p3 = scmp.ne.s32.totalorder %s20_s13, %s280_s21  ;;  %p286_p5 = scmp.lt.s32.totalorder %s280_s21, %s280_s21 }
   0xb   :  { %p287_p6 = por %p286_p5, %p285_p4 }
   0xd   :  { %p288_p7 = pnand %p287_p6, %p281_p3 }
   0xf   :  { %291 = shalt.err (!%p288_p7)
}
  0x10   :  { %s319_s22 = smov 256   ;;  %s320_s23 = smov 16  }
  0x11   :  { %25 = dma.hbm_to_vmem [thread:$0]  %s376_s2, 1024, %s20_s13, [#allocation4], %s319_s22, %s319_s22, %s320_s23  }
  0x12   :  { %314 = dma.done.wait [#allocation4], 1024  }
  0x13   :  { %315 = vsyncadd [#allocation4], 4294966272  ;;  %v321_v0 = vmov 0.0   ;;  %v322_v1 = vmov 0   ;;  %v34_v2 = vld [vmem:[#allocation3 + $0x8] sm:$0xff]  ;;  %v36_v3 = vld [vmem:[#allocation3 + $0x18] sm:$0xff]  ;;  %v211_v60 = vlaneseq }
  0x14   :  { %164 = vmatprep.mubr.f32.mxu0 %v321_v0  ;;  %261 = vset.pattern.permute.xlu0 %v322_v1  ;;  %v38_v4 = vld [vmem:[#allocation3 + $0x28] sm:$0xff]  ;;  %v40_v5 = vld [vmem:[#allocation3 + $0x38] sm:$0xff]  ;;  %v42_v6 = vmul.f32 %v34_v2, %v34_v2  ;;  %v44_v7 = vmul.f32 %v36_v3, %v36_v3  ;;  %v33_v9 = vld [vmem:[#allocation3] sm:$0xff]  ;;  %vm96_vm0 = vcmask 261120  }
  0x15   :  { %v46_v8 = vmul.f32 %v38_v4, %v38_v4  ;;  %v35_v10 = vld [vmem:[#allocation3 + $0x10] sm:$0xff]  ;;  %v37_v11 = vld [vmem:[#allocation3 + $0x20] sm:$0xff]  ;;  %v41_v13 = vmul.f32 %v33_v9, %v33_v9  ;;  %v48_v15 = vmul.f32 %v40_v5, %v40_v5  ;;  %v212_v61 = vand.u32 127, %v211_v60 }
  0x16   :  { %v39_v12 = vld [vmem:[#allocation3 + $0x30] sm:$0xff]  ;;  %v43_v14 = vmul.f32 %v35_v10, %v35_v10  ;;  %v58_v16 = vadd.f32 %v44_v7, %v42_v6  ;;  %v45_v17 = vmul.f32 %v37_v11, %v37_v11 }
  0x17   :  { %v207_v18 = vld [vmem:[%s374_s0] sm:$0xff]  ;;  %v47_v19 = vmul.f32 %v39_v12, %v39_v12  ;;  %v213_v1 = vadd.s32 128, %v212_v61 }
  0x18   :  { %v49_v20 = vadd.f32 %v43_v14, %v41_v13  ;;  %215 = vperm.xlu0 %261, %v207_v18   ;;  %v59_v21 = vadd.f32 %v58_v16, %v46_v8  ;;  %v87_v51 = vld [vmem:[%s375_s1] sm:$0xff]  ;;  %s323_s1 = smov [#allocation6]  }
  0x19   :  { %s231_s28 = sshll.u32 %s323_s1, 4  ;;  %s232_s28 = int_to_ptr.vmem [resolvable:$true] %s231_s28 }
  0x1a   :  { %v50_v22 = vadd.f32 %v49_v20, %v45_v17  ;;  %v60_v23 = vadd.f32 %v59_v21, %v48_v15  ;;  %s292_s29 = scalar_lea.vmem %s232_s28, 256  ;;  %p297_p9 = scmp.lt.s32.totalorder %s232_s28, %s232_s28 }
  0x1b   :  { %p293_p8 = scmp.ne.s32.totalorder %s232_s28, %s292_s29  ;;  %p298_p10 = scmp.lt.s32.totalorder %s292_s29, %s292_s29 }
  0x1c   :  { %v51_v24 = vadd.f32 %v50_v22, %v47_v19  ;;  %v61_v25 = vrot.slane %v60_v23, 4 }
  0x1d   :  { %p299_p11 = por %p298_p10, %p297_p9 }
  0x1e   :  { %v52_v26 = vrot.slane %v51_v24, 4  ;;  %v62_v27 = vadd.f32 %v61_v25, %v60_v23 }
  0x1f   :  { %p300_p12 = pnand %p299_p11, %p293_p8 }
  0x20   :  { %v53_v28 = vadd.f32 %v52_v26, %v51_v24  ;;  %v63_v29 = vrot.slane %v62_v27, 2 }
  0x22   :  { %v54_v30 = vrot.slane %v53_v28, 2  ;;  %v64_v31 = vadd.f32 %v63_v29, %v62_v27 }
  0x24   :  { %v55_v32 = vadd.f32 %v54_v30, %v53_v28  ;;  %v65_v33 = vrot.slane %v64_v31, 1 }
  0x26   :  { %v56_v34 = vrot.slane %v55_v32, 1  ;;  %v66_v35 = vadd.f32 %v65_v33, %v64_v31 }
  0x28   :  { %v57_v36 = vadd.f32 %v56_v34, %v55_v32  ;;  %262 = vrsqrt.f32 %v66_v35 }
  0x2a   :  { %264 = vrsqrt.f32 %v57_v36 }
  0x32   :  { %v263_v37 = vpop.eup %262 }
  0x33   :  { %v72_v39 = vmul.f32 %v263_v37, %v34_v2  ;;  %v74_v40 = vmul.f32 %v263_v37, %v36_v3  ;;  %v76_v41 = vmul.f32 %v263_v37, %v38_v4  ;;  %v78_v42 = vmul.f32 %v263_v37, %v40_v5 }
  0x34   :  { %v265_v38 = vpop.eup %264 }
  0x35   :  { %v71_v43 = vmul.f32 %v265_v38, %v33_v9  ;;  %v73_v44 = vmul.f32 %v265_v38, %v35_v10  ;;  %v75_v45 = vmul.f32 %v265_v38, %v37_v11  ;;  %v77_v46 = vmul.f32 %v265_v38, %v39_v12 }
  0x36   :  { %v247_v47 = vpack.c.bf16 %v74_v40, %v72_v39  ;;  %v251_v48 = vpack.c.bf16 %v78_v42, %v76_v41 }
  0x37   :  { %v249_v49 = vpack.c.bf16 %v73_v44, %v71_v43  ;;  %v253_v50 = vpack.c.bf16 %v77_v46, %v75_v45 }
  0x38   :  { %248 = vmatprep.subr.bf16.mxu0 %v247_v47 }
  0x39   :  { %250 = vmatpush1.bf16.msra.mxu0 %v249_v49 }
  0x3a   :  { %252 = vmatprep.subr.bf16.mxu0 %v251_v48 }
  0x3d   :  { %254 = vmatpush1.bf16.msra.mxu0 %v253_v50 }
  0x40   :  { %240 = vmatmul.mubr.msk.f32.vlgmr.msra.gmra.mrb[0].mxu0 %vm96_vm0, %v87_v51 }
  0x97   :  { %v216_v6 = vpop.permute.xlu0 %215 }
  0x98   :  { %vm217_vm5 = vcmp.eq.s32.totalorder %v212_v61, %v216_v6  ;;  %vm218_vm7 = vcmp.eq.s32.totalorder %v213_v1, %v216_v6 }
 0x113   :  { %v166_v52 = vpop.f32.mrb[0].mxu0 }
 0x114   :  { %v241_v53 = vclamps-f32 %v166_v52, 1.0  ;;  %v168_v54 = vpop.f32.mrb[1].mxu0 }
 0x115   :  { %v242_v55 = vclamps-f32 %v168_v54, 1.0 }
 0x116   :  { %v175_v56 = vmul.f32 %v241_v53, %v241_v53  ;;  %v245_v9 = vadd.f32 0.87758255, %v241_v53  ;;  %v193_v11 = vmul.f32 0.87758255, %v241_v53  ;;  %v243_v17 = vadd.f32 -0.23971277, %v241_v53 }
 0x117   :  { %v176_v57 = vmul.f32 %v242_v55, %v242_v55  ;;  %v246_v13 = vadd.f32 0.87758255, %v242_v55  ;;  %v194_v14 = vmul.f32 0.87758255, %v242_v55  ;;  %v244_v19 = vadd.f32 -0.23971277, %v242_v55 }
 0x118   :  { %v177_v58 = vsub.f32 1.0, %v175_v56  ;;  %vm203_vm6 = vcmp.le.f32.partialorder %v245_v9, 0.0 }
 0x119   :  { %v178_v59 = vsub.f32 1.0, %v176_v57  ;;  %vm204_vm8 = vcmp.le.f32.partialorder %v246_v13, 0.0 }
 0x11a   :  { %266 = vrsqrt.f32 %v177_v58  ;;  %vm181_vm1 = vcmp.eq.f32.partialorder %v177_v58, inf  ;;  %v184_v2 = vand.u32 2147483648, %v177_v58  ;;  %vm183_vm2 = vcmp.eq.f32.partialorder %v177_v58, 0.0 }
 0x11b   :  { %268 = vrsqrt.f32 %v178_v59  ;;  %vm188_vm3 = vcmp.eq.f32.partialorder %v178_v59, inf  ;;  %v191_v5 = vand.u32 2147483648, %v178_v59  ;;  %vm190_vm4 = vcmp.eq.f32.partialorder %v178_v59, 0.0 }
 0x124   :  { %v267_v62 = vpop.eup %266 }
 0x125   :  { %v269_v63 = vpop.eup %268  ;;  %v180_v0 = vmul.f32 %v267_v62, %v177_v58 }
 0x126   :  { %v187_v3 = vmul.f32 %v269_v63, %v178_v59 }
 0x127   :  { %v182_v4 = vsel %vm181_vm1, %v177_v58, %v180_v0 }
 0x128   :  { %v185_v7 = vsel %vm183_vm2, %v184_v2, %v182_v4  ;;  %v189_v8 = vsel %vm188_vm3, %v178_v59, %v187_v3 }
 0x129   :  { %v192_v10 = vsel %vm190_vm4, %v191_v5, %v189_v8  ;;  %v195_v12 = vmul.f32 0.47942555, %v185_v7 }
 0x12a   :  { %v196_v15 = vmul.f32 0.47942555, %v192_v10 }
 0x12b   :  { %v197_v16 = vsub.f32 %v193_v11, %v195_v12 }
 0x12c   :  { %v198_v18 = vsub.f32 %v194_v14, %v196_v15 }
 0x12d   :  { %v205_v20 = vsel %vm203_vm6, %v243_v17, %v197_v16 }
 0x12e   :  { %v206_v21 = vsel %vm204_vm8, %v244_v19, %v198_v18  ;;  %v219_v22 = vsel %vm217_vm5, %v205_v20, %v241_v53 }
 0x12f   :  { %v220_v23 = vsel %vm218_vm7, %v206_v21, %v242_v55  ;;  %v221_v24 = vmul.f32 64.0, %v219_v22 }
 0x130   :  { %v222_v25 = vmul.f32 64.0, %v220_v23 }
 0x131   :  { %223 = vst [vmem:[#allocation6] sm:$0xff] %v221_v24 }
 0x132   :  { %224 = vst [vmem:[#allocation6 + $0x8] sm:$0xff] %v222_v25 }
 0x133   :  { %303 = shalt.err (!%p300_p12)
}
 0x134   :  { %s304_s5 = scalar_lea.hbm %s377_s3, 256 }
 0x135   :  { %p305_p13 = scmp.ne.s32.totalorder %s377_s3, %s304_s5  ;;  %p308_p0 = scmp.lt.u32.totalorder %s304_s5, %s377_s3 }
 0x137   :  { %p310_p1 = pnand %p308_p0, %p305_p13 }
 0x139   :  { %313 = shalt.err (!%p310_p1)
}
 0x13a   :  { %234 = dma.vmem_to_hbm [thread:$0]  %s232_s28, 256, %s377_s3, [#allocation5]  }
 0x13b   :  { %316 = dma.done.wait [#allocation5], 256  }
 0x13c   :  { %317 = vsyncadd [#allocation5], 4294967040 }
 0x13d   :  { %238 = vsyncpa [#allocation4], 1 }
 0x13e   :  { %239 = vsyncpa [#allocation5], 1 }

</bundles_post_ra>
